<compile_context>
chip_gen: v5e
topology: v5e:2x2
jax: 0.10.0
libtpu: 0.0.40
codegen_flags: <defaults>
</compile_context>

<pallas_src>
import jax
import jax.numpy as jnp
from jax.experimental import pallas as pl
from jax.experimental.pallas import tpu as pltpu

H1, H2 = 400, 300          # logical hidden widths (PyTorch spec)
H1P, H2P = 512, 384        # lane-aligned padded hidden widths
SMALL_B = 1024             # up to this batch: single un-gridded invocation


def _round_up(a, b):
    return ((a + b - 1) // b) * b


def qnet_kernel(xa_ref, w1_ref, b1_ref, w2x_ref, w2a_ref, b2_ref,
                w3_ref, b3_ref, out_ref):
    """One batch tile: xa (TB, KP) bf16 -> out (1, TB) f32 (lane-dense row)."""
    xa = xa_ref[...]                                             # bf16 (TB, KP)

    # affine1 + ReLU.  Action/pad rows of W1 are zero, so this equals x @ W1.
    h1 = jnp.dot(xa, w1_ref[...],
                 preferred_element_type=jnp.float32) + b1_ref[...]
    h1 = jnp.maximum(h1, 0.0)

    # affine2 on concat([h1, action]) = h1 @ W2x + xa @ W2a  (x rows of W2a = 0)
    h2 = (jnp.dot(h1.astype(jnp.bfloat16), w2x_ref[...],
                  preferred_element_type=jnp.float32)
          + jnp.dot(xa, w2a_ref[...], preferred_element_type=jnp.float32)
          + b2_ref[...])
    h2 = jnp.maximum(h2, 0.0)

    # value_head (out_features = 1): VPU multiply + XLU lane reduction; stored
    # as a lane-dense (1, TB) row -> unmasked vst, no per-tile partial stores.
    vals = jnp.sum(h2 * w3_ref[...], axis=-1) + b3_ref[0]        # (TB,)
    out_ref[...] = vals.reshape(1, -1)


def q_net_forward(x, action, packed):
    """x: (B, ob_sp), action: (B, act_sp) -> (B, 1) f32."""
    w1, b1, w2x, w2a, b2, w3, b3 = packed
    B, ob_sp = x.shape
    act_sp = action.shape[1]
    KP = w1.shape[0]
    assert ob_sp + act_sp <= KP

    # One lane-padded bf16 input slab: [x | action | 0] -> (B, KP).
    pad = jnp.zeros((B, KP - ob_sp - act_sp), jnp.bfloat16)
    xa = jnp.concatenate(
        [x.astype(jnp.bfloat16), action.astype(jnp.bfloat16), pad], axis=1)

    smem = pl.BlockSpec(memory_space=pltpu.MemorySpace.SMEM)
    vmem = pl.BlockSpec(memory_space=pltpu.MemorySpace.VMEM)
    weights = (w1, b1, w2x, w2a, b2, w3, b3)

    def cost(b):
        flops = 2 * b * (KP * H1P + H1P * H2P + KP * H2P + H2P)
        bytes_accessed = ((w1.size + w2x.size + w2a.size) * 2      # bf16 weights
                          + (b1.size + b2.size + w3.size + b3.size) * 4
                          + b * KP * 2                             # bf16 inputs
                          + b * 4)                                 # f32 output
        return pl.CostEstimate(flops=flops, transcendentals=0,
                               bytes_accessed=bytes_accessed)

    if B <= SMALL_B:
        # Single un-gridded invocation: everything fits in VMEM; no grid-step
        # overhead (a batch grid is just a serial loop on single-TC v5e/v6e).
        out = pl.pallas_call(
            qnet_kernel,
            out_shape=jax.ShapeDtypeStruct((1, B), jnp.float32),
            in_specs=[vmem] * 7 + [smem],
            out_specs=vmem,
            cost_estimate=cost(B),
        )(xa, *weights)
        return out[0, :].reshape(B, 1)

    # Large batch: a few large tiles (>= 2 so "parallel" can shard across the
    # two v7x TensorCores); pad batch up to a tile multiple so irregular B
    # never falls back to one huge un-gridded block.
    num_tiles = 2 if B <= 4096 else -(-B // 2048)
    TB = _round_up(-(-B // num_tiles), 256)
    Bp = TB * num_tiles
    if Bp > B:
        xa = jnp.concatenate([xa, jnp.zeros((Bp - B, KP), jnp.bfloat16)],
                             axis=0)

    const2 = lambda i: (0, 0)
    in_specs = [
        pl.BlockSpec((TB, KP), lambda i: (i, 0)),   # batch tile of input slab
        pl.BlockSpec(w1.shape, const2),
        pl.BlockSpec(b1.shape, const2),
        pl.BlockSpec(w2x.shape, const2),
        pl.BlockSpec(w2a.shape, const2),
        pl.BlockSpec(b2.shape, const2),
        pl.BlockSpec(w3.shape, const2),
        smem,                                        # b3 scalar
    ]
    out = pl.pallas_call(
        qnet_kernel,
        out_shape=jax.ShapeDtypeStruct((1, Bp), jnp.float32),
        grid=(num_tiles,),
        in_specs=in_specs,
        out_specs=pl.BlockSpec((1, TB), lambda i: (0, i)),   # lane-dense rows
        compiler_params=pltpu.CompilerParams(
            dimension_semantics=("parallel",),
            vmem_limit_bytes=32 * 1024 * 1024),
        cost_estimate=cost(Bp),
    )(xa, *weights)
    return out[0, :B].reshape(B, 1)


def init_params(key, ob_sp, act_sp):
    """Logical (un-padded, f32) parameters matching the PyTorch module."""
    ks = jax.random.split(key, 6)
    scale = 0.05
    w1 = scale * jax.random.normal(ks[0], (ob_sp, H1), jnp.float32)
    b1 = scale * jax.random.normal(ks[1], (H1,), jnp.float32)
    w2 = scale * jax.random.normal(ks[2], (H1 + act_sp, H2), jnp.float32)
    b2 = scale * jax.random.normal(ks[3], (H2,), jnp.float32)
    w3 = scale * jax.random.normal(ks[4], (H2, 1), jnp.float32)
    b3 = scale * jax.random.normal(ks[5], (1,), jnp.float32)
    return (w1, b1, w2, b2, w3, b3)


def pack_params(params, ob_sp, act_sp):
    """Pad hiddens to (512, 384), embed x/action weights into one KP-wide
    input dimension, cast big weights to bf16, keep biases/value-row f32."""
    w1, b1, w2, b2, w3, b3 = params
    KP = max(128, _round_up(ob_sp + act_sp, 128))

    w1p = jnp.zeros((KP, H1P), jnp.float32).at[:ob_sp, :H1].set(w1)
    b1p = jnp.zeros((1, H1P), jnp.float32).at[:, :H1].set(b1)

    w2xp = jnp.zeros((H1P, H2P), jnp.float32).at[:H1, :H2].set(w2[:H1])
    w2ap = (jnp.zeros((KP, H2P), jnp.float32)
            .at[ob_sp:ob_sp + act_sp, :H2].set(w2[H1:]))
    b2p = jnp.zeros((1, H2P), jnp.float32).at[:, :H2].set(b2)

    w3p = jnp.zeros((1, H2P), jnp.float32).at[0, :H2].set(w3[:, 0])
    b3p = b3.reshape(1).astype(jnp.float32)          # (1,) scalar, lives in SMEM

    return (w1p.astype(jnp.bfloat16), b1p,
            w2xp.astype(jnp.bfloat16), w2ap.astype(jnp.bfloat16), b2p,
            w3p, b3p)


def q_net_reference(x, action, params):
    """Pure-JAX f32 reference matching the PyTorch forward exactly."""
    w1, b1, w2, b2, w3, b3 = params
    h1 = jax.nn.relu(x @ w1 + b1)
    h2 = jax.nn.relu(jnp.concatenate([h1, action], axis=1) @ w2 + b2)
    return h2 @ w3 + b3


if __name__ == "__main__":
    ob_sp, act_sp, batch = 16, 4, 4

    key = jax.random.PRNGKey(0)
    kx, ka, kp = jax.random.split(key, 3)
    x = jax.random.normal(kx, (batch, ob_sp), jnp.float32)
    action = jax.random.normal(ka, (batch, act_sp), jnp.float32)

    params = init_params(kp, ob_sp, act_sp)
    packed = pack_params(params, ob_sp, act_sp)

    # Small-batch (un-gridded) path.
    out = jax.block_until_ready(q_net_forward(x, action, packed))
    ref = q_net_reference(x, action, params)
    assert out.shape == (batch, 1)
    # bf16 weight/activation streaming -> loosened tolerance vs f32 reference.
    assert jnp.allclose(out, ref, atol=5e-2, rtol=5e-2)

    # Large-batch path: exercises the batch grid, batch padding (1500 is not a
    # tile multiple) and the lane-dense (1, TB)-per-tile output layout.
    Bb = 1500
    xb = jax.random.normal(kx, (Bb, ob_sp), jnp.float32)
    ab = jax.random.normal(ka, (Bb, act_sp), jnp.float32)
    outb = jax.block_until_ready(q_net_forward(xb, ab, packed))
    refb = q_net_reference(xb, ab, params)
    assert outb.shape == (Bb, 1)
    assert jnp.allclose(outb, refb, atol=5e-2, rtol=5e-2)

    print("KERNEL_OK")
</pallas_src>

<mosaic_0001>
module attributes {stable_mosaic.version = 11 : i64} {
  func.func @qnet_kernel(%arg0: memref<4x128xbf16, #tpu.memory_space<vmem>>, %arg1: memref<128x512xbf16, #tpu.memory_space<vmem>>, %arg2: memref<1x512xf32, #tpu.memory_space<vmem>>, %arg3: memref<512x384xbf16, #tpu.memory_space<vmem>>, %arg4: memref<128x384xbf16, #tpu.memory_space<vmem>>, %arg5: memref<1x384xf32, #tpu.memory_space<vmem>>, %arg6: memref<1x384xf32, #tpu.memory_space<vmem>>, %arg7: memref<1xf32, #tpu.memory_space<smem>>, %arg8: memref<1x4xf32, #tpu.memory_space<vmem>>) attributes {dimension_semantics = [], scalar_prefetch = 0 : i64, scratch_operands = 0 : i64, tpu.core_type = #tpu.core_type<tc>} {
    %c0 = arith.constant 0 : index
    %c0_0 = arith.constant 0 : index
    %0 = vector.load %arg0[%c0, %c0_0] : memref<4x128xbf16, #tpu.memory_space<vmem>>, vector<4x128xbf16>
    %c0_1 = arith.constant 0 : index
    %c0_2 = arith.constant 0 : index
    %1 = vector.load %arg1[%c0_1, %c0_2] : memref<128x512xbf16, #tpu.memory_space<vmem>>, vector<128x512xbf16>
    %cst = arith.constant dense<0.000000e+00> : vector<4x512xf32>
    %2 = tpu.matmul %0, %1, %cst {dimension_numbers = #tpu.dot_dimension_numbers<[1], [0], [0], [1], [0, 0, 1, 1], [], []>} : vector<4x128xbf16>, vector<128x512xbf16>, vector<4x512xf32> -> vector<4x512xf32>
    %c0_3 = arith.constant 0 : index
    %c0_4 = arith.constant 0 : index
    %3 = vector.load %arg2[%c0_3, %c0_4] : memref<1x512xf32, #tpu.memory_space<vmem>>, vector<1x512xf32>
    %4 = vector.broadcast %3 : vector<1x512xf32> to vector<4x512xf32>
    %5 = arith.addf %2, %4 : vector<4x512xf32>
    %cst_5 = arith.constant 0.000000e+00 : f32
    %6 = vector.broadcast %cst_5 : f32 to vector<4x512xf32>
    %7 = arith.maximumf %5, %6 : vector<4x512xf32>
    %8 = arith.truncf %7 : vector<4x512xf32> to vector<4x512xbf16>
    %c0_6 = arith.constant 0 : index
    %c0_7 = arith.constant 0 : index
    %9 = vector.load %arg3[%c0_6, %c0_7] : memref<512x384xbf16, #tpu.memory_space<vmem>>, vector<512x384xbf16>
    %cst_8 = arith.constant dense<0.000000e+00> : vector<4x384xf32>
    %10 = tpu.matmul %8, %9, %cst_8 {dimension_numbers = #tpu.dot_dimension_numbers<[1], [0], [0], [1], [0, 0, 1, 1], [], []>} : vector<4x512xbf16>, vector<512x384xbf16>, vector<4x384xf32> -> vector<4x384xf32>
    %c0_9 = arith.constant 0 : index
    %c0_10 = arith.constant 0 : index
    %11 = vector.load %arg4[%c0_9, %c0_10] : memref<128x384xbf16, #tpu.memory_space<vmem>>, vector<128x384xbf16>
    %cst_11 = arith.constant dense<0.000000e+00> : vector<4x384xf32>
    %12 = tpu.matmul %0, %11, %cst_11 {dimension_numbers = #tpu.dot_dimension_numbers<[1], [0], [0], [1], [0, 0, 1, 1], [], []>} : vector<4x128xbf16>, vector<128x384xbf16>, vector<4x384xf32> -> vector<4x384xf32>
    %13 = arith.addf %10, %12 : vector<4x384xf32>
    %c0_12 = arith.constant 0 : index
    %c0_13 = arith.constant 0 : index
    %14 = vector.load %arg5[%c0_12, %c0_13] : memref<1x384xf32, #tpu.memory_space<vmem>>, vector<1x384xf32>
    %15 = vector.broadcast %14 : vector<1x384xf32> to vector<4x384xf32>
    %16 = arith.addf %13, %15 : vector<4x384xf32>
    %cst_14 = arith.constant 0.000000e+00 : f32
    %17 = vector.broadcast %cst_14 : f32 to vector<4x384xf32>
    %18 = arith.maximumf %16, %17 : vector<4x384xf32>
    %c0_15 = arith.constant 0 : index
    %c0_16 = arith.constant 0 : index
    %19 = vector.load %arg6[%c0_15, %c0_16] : memref<1x384xf32, #tpu.memory_space<vmem>>, vector<1x384xf32>
    %20 = vector.broadcast %19 : vector<1x384xf32> to vector<4x384xf32>
    %21 = arith.mulf %18, %20 : vector<4x384xf32>
    %cst_17 = arith.constant dense<0.000000e+00> : vector<4xf32>
    %22 = vector.multi_reduction <add>, %21, %cst_17 [1] : vector<4x384xf32> to vector<4xf32>
    %c0_18 = arith.constant 0 : index
    %23 = memref.load %arg7[%c0_18] : memref<1xf32, #tpu.memory_space<smem>>
    %24 = vector.broadcast %23 : f32 to vector<4xf32>
    %25 = arith.addf %22, %24 : vector<4xf32>
    %26 = vector.shape_cast %25 : vector<4xf32> to vector<1x4xf32>
    %c0_19 = arith.constant 0 : index
    %c0_20 = arith.constant 0 : index
    %27 = vector.load %arg8[%c0_19, %c0_20] : memref<1x4xf32, #tpu.memory_space<vmem>>, vector<1x4xf32>
    tpu.vector_store %arg8[%c0_19, %c0_20], %26 {strides = array<i32>} : memref<1x4xf32, #tpu.memory_space<vmem>>, vector<1x4xf32>,
    return
  }
}

</mosaic_0001>

<bundles_post_ra>
// kernel: tpu_custom_call.1
= control target key start
LH: loop header
LB: loop body
LE: loop exit
PB: predicated region body
PF: predicated region fallthrough
CT: control target
= control target key end

     0   :  { %14 = vsyncpa [#allocation4], 0  ;;  %s2458_s0 = inlined_call_operand.hbm [shape: bf16[4,128], index: 0, kind: input, shape index: {}]   ;;  %s2459_s1 = inlined_call_operand.hbm [shape: bf16[128,512], index: 1, kind: input, shape index: {}]   ;;  %s2460_s2 = inlined_call_operand.hbm [shape: f32[1,512], index: 2, kind: input, shape index: {}]   ;;  %s2461_s3 = inlined_call_operand.hbm [shape: bf16[512,384], index: 3, kind: input, shape index: {}]   ;;  %s2462_s4 = inlined_call_operand.hbm [shape: bf16[128,384], index: 4, kind: input, shape index: {}]   ;;  %s2463_s5 = inlined_call_operand.vmem [shape: f32[1,384], index: 5, kind: input, shape index: {}]   ;;  %s2464_s6 = inlined_call_operand.vmem [shape: f32[1,384], index: 6, kind: input, shape index: {}]   ;;  %s2465_s7 = inlined_call_operand.<no memory space> [shape: f32[1], index: 7, kind: input, shape index: {}]   ;;  %s2466_s8 = inlined_call_operand.hbm [shape: f32[1,4], index: 8, kind: output, shape index: {}]  }
   0x1   :  { %15 = vsyncpa [#allocation7], 0 }
   0x2   :  { %16 = vsyncpa [#allocation10], 0  ;;  %s33_s29 = sshll.u32 %s2459_s1, 4  ;;  %s34_s29 = int_to_ptr.hbm [resolvable:$true] %s33_s29 }
   0x3   :  { %17 = vsyncpa [#allocation5], 0  ;;  %s2347_s30 = smov [#allocation6]   ;;  %s57_s12 = sshll.u32 %s2461_s3, 4  ;;  %s58_s12 = int_to_ptr.hbm [resolvable:$true] %s57_s12 }
   0x4   :  { %s35_s9 = sshll.u32 %s2347_s30, 4  ;;  %s2348_s13 = smov 256   ;;  %s36_s9 = int_to_ptr.vmem [resolvable:$true] %s35_s9 }
   0x5   :  { %s2349_s14 = smov 16   ;;  %s2350_s15 = smov [#allocation9]  }
   0x6   :  { %41 = dma.hbm_to_vmem [thread:$0]  %s34_s29, 4096, %s36_s9, [#allocation7], %s2348_s13, %s2348_s13, %s2349_s14  }
   0x7   :  { %s59_s16 = sshll.u32 %s2350_s15, 4  ;;  %s2351_s17 = smov 192   ;;  %s60_s16 = int_to_ptr.vmem [resolvable:$true] %s59_s16 }
   0x8   :  { %s2352_s18 = smov 12   ;;  %s23_s20 = sshll.u32 %s2458_s0, 4  ;;  %s24_s20 = int_to_ptr.hbm [resolvable:$true] %s23_s20 }
   0x9   :  { %65 = dma.hbm_to_vmem [thread:$0]  %s58_s12, 12288, %s60_s16, [#allocation10], %s2351_s17, %s2351_s17, %s2352_s18  }
   0xa   :  { %s2353_s21 = smov [#allocation3]   ;;  %s47_s24 = sshll.u32 %s2460_s2, 4  ;;  %s48_s24 = int_to_ptr.hbm [resolvable:$true] %s47_s24 }
   0xb   :  { %s25_s22 = sshll.u32 %s2353_s21, 4  ;;  %s2354_s25 = smov [#allocation8]   ;;  %s26_s22 = int_to_ptr.vmem [resolvable:$true] %s25_s22 }
   0xc   :  { %28 = dma.hbm_to_vmem [thread:$0]  %s24_s20, 32, %s26_s22, [#allocation4]  }
   0xd   :  { %s49_s26 = sshll.u32 %s2354_s25, 4  ;;  %s70_s29 = sshll.u32 %s2462_s4, 4  ;;  %s50_s26 = int_to_ptr.vmem [resolvable:$true] %s49_s26  ;;  %s71_s29 = int_to_ptr.hbm [resolvable:$true] %s70_s29 }
   0xe   :  { %52 = dma.hbm_to_vmem [thread:$0]  %s48_s24, 64, %s50_s26, [#allocation7]  }
   0xf   :  { %s2355_s0 = smov [#allocation11]  }
  0x10   :  { %s72_s30 = sshll.u32 %s2355_s0, 4  ;;  %s73_s30 = int_to_ptr.vmem [resolvable:$true] %s72_s30 }
  0x11   :  { %78 = dma.hbm_to_vmem [thread:$0]  %s71_s29, 3072, %s73_s30, [#allocation10], %s2351_s17, %s2351_s17, %s2352_s18  }
  0x12   :  { %2339 = dma.done.wait [#allocation4], 32  }
  0x13   :  { %2340 = vsyncadd [#allocation4], 4294967264 }
  0x14   :  { %2341 = dma.done.wait [#allocation7], 4160  }
  0x15   :  { %2342 = vsyncadd [#allocation7], 4294963136 }
  0x16   :  { %2343 = dma.done.wait [#allocation10], 15360  }
  0x17   :  { %2344 = vsyncadd [#allocation10], 4294951936  ;;  %v1539_v0 = vld [vmem:[#allocation6 + $0xe0] sm:$0xf]  ;;  %v2063_v1 = vld [vmem:[#allocation6 + $0xec] sm:$0xf0] }
  0x18   :  { %v2061_v2 = vld [vmem:[#allocation6 + $0xe4] sm:$0xf]  ;;  %v1540_v3 = vor.u32 %v2063_v1, %v1539_v0  ;;  %v1541_v4 = vld [vmem:[#allocation6 + $0xf0] sm:$0xf0]  ;;  %v1547_v5 = vld [vmem:[#allocation6 + $0xe8] sm:$0xf] }
  0x19   :  { %v2064_v6 = vld [vmem:[#allocation6 + $0xf4] sm:$0xf0]  ;;  %v1544_v7 = vor.u32 %v2061_v2, %v1541_v4  ;;  %v2062_v9 = vld [vmem:[#allocation6 + $0xec] sm:$0xf]  ;;  %v1549_v10 = vld [vmem:[#allocation6 + $0xf8] sm:$0xf0] }
  0x1a   :  { %v1548_v8 = vor.u32 %v2064_v6, %v1547_v5  ;;  %v1523_v11 = vld [vmem:[#allocation6 + $0xc0] sm:$0xf]  ;;  %308 = vmatpush.bf16.msra.mxu0 %v1540_v3  ;;  %v1552_v12 = vor.u32 %v2062_v9, %v1549_v10  ;;  %v2059_v13 = vld [vmem:[#allocation6 + $0xcc] sm:$0xf0]  ;;  %v2057_v14 = vld [vmem:[#allocation6 + $0xc4] sm:$0xf] }
  0x1b   :  { %v1525_v15 = vld [vmem:[#allocation6 + $0xd0] sm:$0xf0]  ;;  %321 = vmatpush.bf16.msra.mxu1 %v1544_v7  ;;  %v1524_v16 = vor.u32 %v2059_v13, %v1523_v11  ;;  %v1531_v18 = vld [vmem:[#allocation6 + $0xc8] sm:$0xf]  ;;  %v2060_v19 = vld [vmem:[#allocation6 + $0xd4] sm:$0xf0] }
  0x1c   :  { %334 = vmatpush.bf16.msra.mxu2 %v1548_v8  ;;  %v1528_v17 = vor.u32 %v2057_v14, %v1525_v15  ;;  %v2058_v20 = vld [vmem:[#allocation6 + $0xcc] sm:$0xf]  ;;  %347 = vmatpush.bf16.msra.mxu3 %v1552_v12  ;;  %v1532_v21 = vor.u32 %v2060_v19, %v1531_v18  ;;  %v1533_v22 = vld [vmem:[#allocation6 + $0xd8] sm:$0xf0]  ;;  %v1507_v23 = vld [vmem:[#allocation6 + $0xa0] sm:$0xf] }
  0x1d   :  { %v2055_v24 = vld [vmem:[#allocation6 + $0xac] sm:$0xf0]  ;;  %v1536_v25 = vor.u32 %v2058_v20, %v1533_v22  ;;  %v2053_v26 = vld [vmem:[#allocation6 + $0xa4] sm:$0xf]  ;;  %v1509_v27 = vld [vmem:[#allocation6 + $0xb0] sm:$0xf0] }
  0x1e   :  { %v1515_v28 = vld [vmem:[#allocation6 + $0xa8] sm:$0xf]  ;;  %309 = vmatpush.bf16.msra.mxu0 %v1524_v16  ;;  %v1508_v29 = vor.u32 %v2055_v24, %v1507_v23  ;;  %v2056_v30 = vld [vmem:[#allocation6 + $0xb4] sm:$0xf0]  ;;  %v2054_v31 = vld [vmem:[#allocation6 + $0xac] sm:$0xf]  ;;  %v1512_v33 = vor.u32 %v2053_v26, %v1509_v27 }
  0x1f   :  { %v1517_v32 = vld [vmem:[#allocation6 + $0xb8] sm:$0xf0]  ;;  %322 = vmatpush.bf16.msra.mxu1 %v1528_v17  ;;  %v1516_v34 = vor.u32 %v2056_v30, %v1515_v28  ;;  %v1491_v35 = vld [vmem:[#allocation6 + $0x80] sm:$0xf]  ;;  %v2051_v36 = vld [vmem:[#allocation6 + $0x8c] sm:$0xf0] }
  0x20   :  { %335 = vmatpush.bf16.msra.mxu2 %v1532_v21  ;;  %v2049_v37 = vld [vmem:[#allocation6 + $0x84] sm:$0xf]  ;;  %348 = vmatpush.bf16.msra.mxu3 %v1536_v25  ;;  %v1520_v38 = vor.u32 %v2054_v31, %v1517_v32  ;;  %v1493_v39 = vld [vmem:[#allocation6 + $0x90] sm:$0xf0]  ;;  %v1499_v40 = vld [vmem:[#allocation6 + $0x88] sm:$0xf]  ;;  %v1492_v44 = vor.u32 %v2051_v36, %v1491_v35 }
  0x21   :  { %v2052_v41 = vld [vmem:[#allocation6 + $0x94] sm:$0xf0]  ;;  %v2050_v42 = vld [vmem:[#allocation6 + $0x8c] sm:$0xf]  ;;  %v1501_v43 = vld [vmem:[#allocation6 + $0x98] sm:$0xf0]  ;;  %v1496_v45 = vor.u32 %v2049_v37, %v1493_v39 }
  0x22   :  { %310 = vmatpush.bf16.msra.mxu0 %v1508_v29  ;;  %v1500_v46 = vor.u32 %v2052_v41, %v1499_v40  ;;  %v1475_v47 = vld [vmem:[#allocation6 + $0x60] sm:$0xf]  ;;  %v2047_v48 = vld [vmem:[#allocation6 + $0x6c] sm:$0xf0]  ;;  %v2045_v49 = vld [vmem:[#allocation6 + $0x64] sm:$0xf]  ;;  %v1504_v50 = vor.u32 %v2050_v42, %v1501_v43 }
  0x23   :  { %323 = vmatpush.bf16.msra.mxu1 %v1512_v33  ;;  %v1477_v51 = vld [vmem:[#allocation6 + $0x70] sm:$0xf0]  ;;  %v1483_v52 = vld [vmem:[#allocation6 + $0x68] sm:$0xf]  ;;  %v2048_v53 = vld [vmem:[#allocation6 + $0x74] sm:$0xf0]  ;;  %v1476_v56 = vor.u32 %v2047_v48, %v1475_v47 }
  0x24   :  { %336 = vmatpush.bf16.msra.mxu2 %v1516_v34  ;;  %349 = vmatpush.bf16.msra.mxu3 %v1520_v38  ;;  %v2046_v54 = vld [vmem:[#allocation6 + $0x6c] sm:$0xf]  ;;  %v1485_v55 = vld [vmem:[#allocation6 + $0x78] sm:$0xf0]  ;;  %v1480_v57 = vor.u32 %v2045_v49, %v1477_v51  ;;  %v1484_v58 = vor.u32 %v2048_v53, %v1483_v52  ;;  %v1459_v59 = vld [vmem:[#allocation6 + $0x40] sm:$0xf] }
  0x25   :  { %v2043_v60 = vld [vmem:[#allocation6 + $0x4c] sm:$0xf0]  ;;  %v2041_v61 = vld [vmem:[#allocation6 + $0x44] sm:$0xf]  ;;  %v1488_v62 = vor.u32 %v2046_v54, %v1485_v55  ;;  %v1461_v63 = vld [vmem:[#allocation6 + $0x50] sm:$0xf0] }
  0x26   :  { %311 = vmatpush.bf16.msra.mxu0 %v1492_v44  ;;  %v1467_v0 = vld [vmem:[#allocation6 + $0x48] sm:$0xf]  ;;  %v2044_v1 = vld [vmem:[#allocation6 + $0x54] sm:$0xf0]  ;;  %v2042_v2 = vld [vmem:[#allocation6 + $0x4c] sm:$0xf]  ;;  %v1460_v4 = vor.u32 %v2043_v60, %v1459_v59  ;;  %v1464_v5 = vor.u32 %v2041_v61, %v1461_v63 }
  0x27   :  { %324 = vmatpush.bf16.msra.mxu1 %v1496_v45  ;;  %v1469_v3 = vld [vmem:[#allocation6 + $0x58] sm:$0xf0]  ;;  %v1468_v6 = vor.u32 %v2044_v1, %v1467_v0  ;;  %v1443_v7 = vld [vmem:[#allocation6 + $0x20] sm:$0xf]  ;;  %v2039_v8 = vld [vmem:[#allocation6 + $0x2c] sm:$0xf0] }
  0x28   :  { %337 = vmatpush.bf16.msra.mxu2 %v1500_v46  ;;  %350 = vmatpush.bf16.msra.mxu3 %v1504_v50  ;;  %v2037_v9 = vld [vmem:[#allocation6 + $0x24] sm:$0xf]  ;;  %v1472_v10 = vor.u32 %v2042_v2, %v1469_v3  ;;  %v1445_v11 = vld [vmem:[#allocation6 + $0x30] sm:$0xf0]  ;;  %v1451_v12 = vld [vmem:[#allocation6 + $0x28] sm:$0xf]  ;;  %v1444_v16 = vor.u32 %v2039_v8, %v1443_v7 }
  0x29   :  { %v2040_v13 = vld [vmem:[#allocation6 + $0x34] sm:$0xf0]  ;;  %v2038_v14 = vld [vmem:[#allocation6 + $0x2c] sm:$0xf]  ;;  %v1453_v15 = vld [vmem:[#allocation6 + $0x38] sm:$0xf0]  ;;  %v1448_v18 = vor.u32 %v2037_v9, %v1445_v11 }
  0x2a   :  { %312 = vmatpush.bf16.msra.mxu0 %v1476_v56  ;;  %v1427_v17 = vld [vmem:[#allocation6] sm:$0xf]  ;;  %v1452_v19 = vor.u32 %v2040_v13, %v1451_v12  ;;  %v2035_v20 = vld [vmem:[#allocation6 + $0xc] sm:$0xf0]  ;;  %v2033_v21 = vld [vmem:[#allocation6 + $0x4] sm:$0xf]  ;;  %v1456_v23 = vor.u32 %v2038_v14, %v1453_v15 }
  0x2b   :  { %325 = vmatpush.bf16.msra.mxu1 %v1480_v57  ;;  %v1429_v22 = vld [vmem:[#allocation6 + $0x10] sm:$0xf0]  ;;  %v1435_v24 = vld [vmem:[#allocation6 + $0x8] sm:$0xf]  ;;  %v2036_v25 = vld [vmem:[#allocation6 + $0x14] sm:$0xf0]  ;;  %v1428_v30 = vor.u32 %v2035_v20, %v1427_v17 }
  0x2c   :  { %338 = vmatpush.bf16.msra.mxu2 %v1484_v58  ;;  %351 = vmatpush.bf16.msra.mxu3 %v1488_v62  ;;  %v2034_v26 = vld [vmem:[#allocation6 + $0xc] sm:$0xf]  ;;  %v1437_v27 = vld [vmem:[#allocation6 + $0x18] sm:$0xf0]  ;;  %v2183_v29 = vld [vmem:[#allocation11 + $0xb0] sm:$0xf0]  ;;  %v1432_v33 = vor.u32 %v2033_v21, %v1429_v22  ;;  %v1436_v34 = vor.u32 %v2036_v25, %v1435_v24 }
  0x2d   :  { %v1639_v28 = vld [vmem:[#allocation11 + $0xa8] sm:$0xf]  ;;  %v2182_v31 = vld [vmem:[#allocation11 + $0xac] sm:$0xf]  ;;  %v1641_v32 = vld [vmem:[#allocation11 + $0xb4] sm:$0xf0]  ;;  %v1440_v35 = vor.u32 %v2034_v26, %v1437_v27 }
  0x2e   :  { %313 = vmatpush.bf16.msra.mxu0 %v1460_v4  ;;  %v1640_v36 = vor.u32 %v2183_v29, %v1639_v28  ;;  %v1647_v37 = vld [vmem:[#allocation11 + $0xb0] sm:$0xf]  ;;  %v2184_v38 = vld [vmem:[#allocation11 + $0xb8] sm:$0xf0]  ;;  %v1644_v41 = vor.u32 %v2182_v31, %v1641_v32  ;;  %v2417_v42 = vld [vmem:[#allocation3] sm:$0x3] }
  0x2f   :  { %326 = vmatpush.bf16.msra.mxu1 %v1464_v5  ;;  %v1627_v39 = vld [vmem:[#allocation11 + $0x90] sm:$0xf]  ;;  %v2180_v40 = vld [vmem:[#allocation11 + $0x98] sm:$0xf0]  ;;  %v2179_v43 = vld [vmem:[#allocation11 + $0x94] sm:$0xf]  ;;  %v1648_v45 = vor.u32 %v2184_v38, %v1647_v37 }
  0x30   :  { %339 = vmatpush.bf16.msra.mxu2 %v1468_v6  ;;  %352 = vmatpush.bf16.msra.mxu3 %v1472_v10  ;;  %v1629_v44 = vld [vmem:[#allocation11 + $0x9c] sm:$0xf0]  ;;  %v1628_v46 = vor.u32 %v2180_v40, %v1627_v39  ;;  %v1635_v47 = vld [vmem:[#allocation11 + $0x98] sm:$0xf]  ;;  %v2181_v48 = vld [vmem:[#allocation11 + $0xa0] sm:$0xf0] }
  0x31   :  { %v1615_v49 = vld [vmem:[#allocation11 + $0x78] sm:$0xf]  ;;  %v2177_v50 = vld [vmem:[#allocation11 + $0x80] sm:$0xf0]  ;;  %v1632_v51 = vor.u32 %v2179_v43, %v1629_v44  ;;  %v2176_v52 = vld [vmem:[#allocation11 + $0x7c] sm:$0xf]  ;;  %v1636_v56 = vor.u32 %v2181_v48, %v1635_v47 }
  0x32   :  { %314 = vmatpush.bf16.msra.mxu0 %v1444_v16  ;;  %v1617_v53 = vld [vmem:[#allocation11 + $0x84] sm:$0xf0]  ;;  %v2087_v55 = vld [vmem:[#allocation9 + $0xb0] sm:$0xf0]  ;;  %v1616_v58 = vor.u32 %v2177_v50, %v1615_v49  ;;  %v1623_v59 = vld [vmem:[#allocation11 + $0x80] sm:$0xf] }
  0x33   :  { %327 = vmatpush.bf16.msra.mxu1 %v1448_v18  ;;  %v1735_v54 = vld [vmem:[#allocation9 + $0xa8] sm:$0xf]  ;;  %v2178_v60 = vld [vmem:[#allocation11 + $0x88] sm:$0xf0]  ;;  %v1723_v61 = vld [vmem:[#allocation9 + $0x90] sm:$0xf]  ;;  %v1620_v0 = vor.u32 %v2176_v52, %v1617_v53 }
  0x34   :  { %340 = vmatpush.bf16.msra.mxu2 %v1452_v19  ;;  %353 = vmatpush.bf16.msra.mxu3 %v1456_v23  ;;  %v1736_v57 = vor.u32 %v2087_v55, %v1735_v54  ;;  %v1603_v62 = vld [vmem:[#allocation11 + $0x60] sm:$0xf]  ;;  %v2174_v63 = vld [vmem:[#allocation11 + $0x68] sm:$0xf0]  ;;  %v2084_v1 = vld [vmem:[#allocation9 + $0x98] sm:$0xf0]  ;;  %v1624_v5 = vor.u32 %v2178_v60, %v1623_v59 }
  0x35   :  { %v2173_v2 = vld [vmem:[#allocation11 + $0x64] sm:$0xf]  ;;  %v1605_v3 = vld [vmem:[#allocation11 + $0x6c] sm:$0xf0]  ;;  %v1724_v4 = vor.u32 %v2084_v1, %v1723_v61  ;;  %v1604_v6 = vor.u32 %v2174_v63, %v1603_v62  ;;  %v1611_v7 = vld [vmem:[#allocation11 + $0x68] sm:$0xf] }
  0x36   :  { %315 = vmatpush.bf16.msra.mxu0 %v1428_v30  ;;  %v2175_v8 = vld [vmem:[#allocation11 + $0x70] sm:$0xf0]  ;;  %v1711_v9 = vld [vmem:[#allocation9 + $0x78] sm:$0xf]  ;;  %v1591_v10 = vld [vmem:[#allocation11 + $0x48] sm:$0xf]  ;;  %v1608_v12 = vor.u32 %v2173_v2, %v1605_v3 }
  0x37   :  { %328 = vmatpush.bf16.msra.mxu1 %v1432_v33  ;;  %v2171_v11 = vld [vmem:[#allocation11 + $0x50] sm:$0xf0]  ;;  %v2081_v13 = vld [vmem:[#allocation9 + $0x80] sm:$0xf0]  ;;  %v2170_v14 = vld [vmem:[#allocation11 + $0x4c] sm:$0xf]  ;;  %v1612_v17 = vor.u32 %v2175_v8, %v1611_v7 }
  0x38   :  { %341 = vmatpush.bf16.msra.mxu2 %v1436_v34  ;;  %354 = vmatpush.bf16.msra.mxu3 %v1440_v35  ;;  %v1593_v15 = vld [vmem:[#allocation11 + $0x54] sm:$0xf0]  ;;  %v1712_v16 = vor.u32 %v2081_v13, %v1711_v9  ;;  %v1699_v18 = vld [vmem:[#allocation9 + $0x60] sm:$0xf]  ;;  %v2078_v19 = vld [vmem:[#allocation9 + $0x68] sm:$0xf0]  ;;  %v1592_v20 = vor.u32 %v2171_v11, %v1591_v10 }
  0x39   :  { %316 = vmatmul.bf16.vlgmr.msra.gmra.mxu0 %v2417_v42  ;;  %v1599_v21 = vld [vmem:[#allocation11 + $0x50] sm:$0xf]  ;;  %v2172_v22 = vld [vmem:[#allocation11 + $0x58] sm:$0xf0]  ;;  %v1596_v25 = vor.u32 %v2170_v14, %v1593_v15  ;;  %v2167_v26 = vld [vmem:[#allocation11 + $0x34] sm:$0xf]  ;;  %v1700_v27 = vor.u32 %v2078_v19, %v1699_v18 }
  0x3a   :  { %656 = vmatpush.bf16.msrb.mxu0 %v1640_v36  ;;  %329 = vmatmul.bf16.vlgmr.msra.gmra.mxu1 %v2417_v42  ;;  %v1579_v23 = vld [vmem:[#allocation11 + $0x30] sm:$0xf]  ;;  %v2168_v24 = vld [vmem:[#allocation11 + $0x38] sm:$0xf0]  ;;  %v1581_v28 = vld [vmem:[#allocation11 + $0x3c] sm:$0xf0]  ;;  %v1600_v31 = vor.u32 %v2172_v22, %v1599_v21 }
  0x3b   :  { %669 = vmatpush.bf16.msrb.mxu1 %v1644_v41  ;;  %342 = vmatmul.bf16.vlgmr.msra.gmra.mxu2 %v2417_v42  ;;  %v1687_v29 = vld [vmem:[#allocation9 + $0x48] sm:$0xf]  ;;  %v2075_v30 = vld [vmem:[#allocation9 + $0x50] sm:$0xf0]  ;;  %v1580_v32 = vor.u32 %v2168_v24, %v1579_v23  ;;  %v1587_v33 = vld [vmem:[#allocation11 + $0x38] sm:$0xf]  ;;  %v1584_v37 = vor.u32 %v2167_v26, %v1581_v28 }
  0x3c   :  { %355 = vmatmul.bf16.vlgmr.msra.gmra.mxu3 %v2417_v42  ;;  %682 = vmatpush.bf16.msrb.mxu2 %v1648_v45  ;;  %v2169_v34 = vld [vmem:[#allocation11 + $0x40] sm:$0xf0]  ;;  %v1567_v35 = vld [vmem:[#allocation11 + $0x18] sm:$0xf]  ;;  %v2164_v38 = vld [vmem:[#allocation11 + $0x1c] sm:$0xf]  ;;  %v1688_v39 = vor.u32 %v2075_v30, %v1687_v29 }
  0x3d   :  { %1207 = vmatpush.bf16.msrb.mxu3 %v1736_v57  ;;  %v2165_v36 = vld [vmem:[#allocation11 + $0x20] sm:$0xf0]  ;;  %v1569_v40 = vld [vmem:[#allocation11 + $0x24] sm:$0xf0]  ;;  %v1675_v41 = vld [vmem:[#allocation9 + $0x30] sm:$0xf]  ;;  %v1588_v44 = vor.u32 %v2169_v34, %v1587_v33 }
  0x3e   :  { %657 = vmatpush.bf16.msrb.mxu0 %v1628_v46  ;;  %v2072_v43 = vld [vmem:[#allocation9 + $0x38] sm:$0xf0]  ;;  %v1568_v45 = vor.u32 %v2165_v36, %v1567_v35  ;;  %v1555_v46 = vld [vmem:[#allocation11] sm:$0xf]  ;;  %v2166_v48 = vld [vmem:[#allocation11 + $0x28] sm:$0xf0]  ;;  %v1572_v52 = vor.u32 %v2164_v38, %v1569_v40 }
  0x3f   :  { %670 = vmatpush.bf16.msrb.mxu1 %v1632_v51  ;;  %v1575_v47 = vld [vmem:[#allocation11 + $0x20] sm:$0xf]  ;;  %v2162_v49 = vld [vmem:[#allocation11 + $0x8] sm:$0xf0]  ;;  %v1831_v50 = vld [vmem:[#allocation9 + $0x168] sm:$0xf]  ;;  %v1676_v53 = vor.u32 %v2072_v43, %v1675_v41 }
  0x40   :  { %683 = vmatpush.bf16.msrb.mxu2 %v1636_v56  ;;  %v2111_v51 = vld [vmem:[#allocation9 + $0x170] sm:$0xf0]  ;;  %v2161_v54 = vld [vmem:[#allocation11 + $0x4] sm:$0xf]  ;;  %v1557_v55 = vld [vmem:[#allocation11 + $0xc] sm:$0xf0]  ;;  %v1576_v57 = vor.u32 %v2166_v48, %v1575_v47  ;;  %v1556_v61 = vor.u32 %v2162_v49, %v1555_v46 }
  0x41   :  { %1208 = vmatpush.bf16.msrb.mxu3 %v1724_v4  ;;  %v1927_v56 = vld [vmem:[#allocation9 + $0x228] sm:$0xf]  ;;  %v1663_v59 = vld [vmem:[#allocation9 + $0x18] sm:$0xf]  ;;  %v2069_v60 = vld [vmem:[#allocation9 + $0x20] sm:$0xf0]  ;;  %v1560_v1 = vor.u32 %v2161_v54, %v1557_v55 }
  0x42   :  { %658 = vmatpush.bf16.msrb.mxu0 %v1616_v58  ;;  %v2135_v58 = vld [vmem:[#allocation9 + $0x230] sm:$0xf0]  ;;  %v1563_v62 = vld [vmem:[#allocation11 + $0x8] sm:$0xf]  ;;  %v1819_v4 = vld [vmem:[#allocation9 + $0x150] sm:$0xf]  ;;  %v1664_v7 = vor.u32 %v2069_v60, %v1663_v59 }
  0x43   :  { %671 = vmatpush.bf16.msrb.mxu1 %v1620_v0  ;;  %v2163_v63 = vld [vmem:[#allocation11 + $0x10] sm:$0xf0]  ;;  %v1832_v0 = vor.u32 %v2111_v51, %v1831_v50  ;;  %v2023_v2 = vld [vmem:[#allocation9 + $0x2e8] sm:$0xf]  ;;  %v1915_v9 = vld [vmem:[#allocation9 + $0x210] sm:$0xf] }
  0x44   :  { %684 = vmatpush.bf16.msrb.mxu2 %v1624_v5  ;;  %v2159_v3 = vld [vmem:[#allocation9 + $0x2f0] sm:$0xf0]  ;;  %v2108_v5 = vld [vmem:[#allocation9 + $0x158] sm:$0xf0]  ;;  %v1564_v8 = vor.u32 %v2163_v63, %v1563_v62  ;;  %v1651_v13 = vld [vmem:[#allocation9] sm:$0xf] }
  0x45   :  { %1209 = vmatpush.bf16.msrb.mxu3 %v1712_v16  ;;  %v2132_v10 = vld [vmem:[#allocation9 + $0x218] sm:$0xf0]  ;;  %v2024_v11 = vor.u32 %v2159_v3, %v2023_v2  ;;  %v2066_v14 = vld [vmem:[#allocation9 + $0x8] sm:$0xf0]  ;;  %v1820_v15 = vor.u32 %v2108_v5, %v1819_v4  ;;  %v1737_v18 = vld [vmem:[#allocation9 + $0xb4] sm:$0xf0] }
  0x46   :  { %659 = vmatpush.bf16.msrb.mxu0 %v1604_v6  ;;  %v1928_v6 = vor.u32 %v2135_v58, %v1927_v56  ;;  %v2156_v16 = vld [vmem:[#allocation9 + $0x2d8] sm:$0xf0]  ;;  %v1807_v19 = vld [vmem:[#allocation9 + $0x138] sm:$0xf]  ;;  %v1916_v21 = vor.u32 %v2132_v10, %v1915_v9  ;;  %v2129_v23 = vld [vmem:[#allocation9 + $0x200] sm:$0xf0]  ;;  %v1652_v24 = vor.u32 %v2066_v14, %v1651_v13 }
  0x47   :  { %672 = vmatpush.bf16.msrb.mxu1 %v1608_v12  ;;  %v2011_v12 = vld [vmem:[#allocation9 + $0x2d0] sm:$0xf]  ;;  %v1903_v22 = vld [vmem:[#allocation9 + $0x1f8] sm:$0xf]  ;;  %v2153_v29 = vld [vmem:[#allocation9 + $0x2c0] sm:$0xf0] }
  0x48   :  { %685 = vmatpush.bf16.msrb.mxu2 %v1612_v17  ;;  %v2086_v17 = vld [vmem:[#allocation9 + $0xac] sm:$0xf]  ;;  %v1999_v26 = vld [vmem:[#allocation9 + $0x2b8] sm:$0xf]  ;;  %v2083_v30 = vld [vmem:[#allocation9 + $0x94] sm:$0xf]  ;;  %v1904_v34 = vor.u32 %v2129_v23, %v1903_v22 }
  0x49   :  { %1210 = vmatpush.bf16.msrb.mxu3 %v1700_v27  ;;  %v1740_v27 = vor.u32 %v2086_v17, %v1737_v18  ;;  %v2102_v33 = vld [vmem:[#allocation9 + $0x128] sm:$0xf0]  ;;  %v1891_v35 = vld [vmem:[#allocation9 + $0x1e0] sm:$0xf]  ;;  %v2080_v43 = vld [vmem:[#allocation9 + $0x7c] sm:$0xf] }
  0x4a   :  { %660 = vmatpush.bf16.msrb.mxu0 %v1592_v20  ;;  %v2105_v20 = vld [vmem:[#allocation9 + $0x140] sm:$0xf0]  ;;  %v2126_v36 = vld [vmem:[#allocation9 + $0x1e8] sm:$0xf0]  ;;  %v1987_v38 = vld [vmem:[#allocation9 + $0x2a0] sm:$0xf] }
  0x4b   :  { %673 = vmatpush.bf16.msrb.mxu1 %v1596_v25  ;;  %v2012_v25 = vor.u32 %v2156_v16, %v2011_v12  ;;  %v1808_v28 = vor.u32 %v2105_v20, %v1807_v19  ;;  %v2150_v41 = vld [vmem:[#allocation9 + $0x2a8] sm:$0xf0]  ;;  %v2099_v46 = vld [vmem:[#allocation9 + $0x110] sm:$0xf0]  ;;  %v1892_v47 = vor.u32 %v2126_v36, %v1891_v35  ;;  %v1879_v48 = vld [vmem:[#allocation9 + $0x1c8] sm:$0xf] }
  0x4c   :  { %686 = vmatpush.bf16.msrb.mxu2 %v1600_v31  ;;  %v1725_v31 = vld [vmem:[#allocation9 + $0x9c] sm:$0xf0]  ;;  %v2123_v49 = vld [vmem:[#allocation9 + $0x1d0] sm:$0xf0]  ;;  %v1975_v50 = vld [vmem:[#allocation9 + $0x288] sm:$0xf] }
  0x4d   :  { %1211 = vmatpush.bf16.msrb.mxu3 %v1688_v39  ;;  %v1728_v39 = vor.u32 %v2083_v30, %v1725_v31  ;;  %v2077_v54 = vld [vmem:[#allocation9 + $0x64] sm:$0xf]  ;;  %v1701_v55 = vld [vmem:[#allocation9 + $0x6c] sm:$0xf0]  ;;  %v1880_v58 = vor.u32 %v2123_v49, %v1879_v48  ;;  %v2120_v60 = vld [vmem:[#allocation9 + $0x1b8] sm:$0xf0] }
  0x4e   :  { %661 = vmatpush.bf16.msrb.mxu0 %v1580_v32  ;;  %v1795_v32 = vld [vmem:[#allocation9 + $0x120] sm:$0xf]  ;;  %v1771_v56 = vld [vmem:[#allocation9 + $0xf0] sm:$0xf]  ;;  %v1704_v63 = vor.u32 %v2077_v54, %v1701_v55  ;;  %v2074_v2 = vld [vmem:[#allocation9 + $0x4c] sm:$0xf] }
  0x4f   :  { %674 = vmatpush.bf16.msrb.mxu1 %v1584_v37  ;;  %v2000_v37 = vor.u32 %v2153_v29, %v1999_v26  ;;  %v1796_v40 = vor.u32 %v2102_v33, %v1795_v32  ;;  %v1867_v59 = vld [vmem:[#allocation9 + $0x1b0] sm:$0xf]  ;;  %v1689_v3 = vld [vmem:[#allocation9 + $0x54] sm:$0xf0]  ;;  %v2093_v5 = vld [vmem:[#allocation9 + $0xe0] sm:$0xf0] }
  0x50   :  { %687 = vmatpush.bf16.msrb.mxu2 %v1588_v44  ;;  %v1713_v44 = vld [vmem:[#allocation9 + $0x84] sm:$0xf0]  ;;  %v1963_v62 = vld [vmem:[#allocation9 + $0x270] sm:$0xf]  ;;  %v1759_v4 = vld [vmem:[#allocation9 + $0xd8] sm:$0xf] }
  0x51   :  { %1212 = vmatpush.bf16.msrb.mxu3 %v1676_v53  ;;  %v1716_v51 = vor.u32 %v2080_v43, %v1713_v44  ;;  %v2147_v53 = vld [vmem:[#allocation9 + $0x290] sm:$0xf0]  ;;  %v1951_v10 = vld [vmem:[#allocation9 + $0x258] sm:$0xf]  ;;  %v1760_v12 = vor.u32 %v2093_v5, %v1759_v4  ;;  %v2141_v13 = vld [vmem:[#allocation9 + $0x260] sm:$0xf0] }
  0x52   :  { %662 = vmatpush.bf16.msrb.mxu0 %v1568_v45  ;;  %v1783_v45 = vld [vmem:[#allocation9 + $0x108] sm:$0xf]  ;;  %v2071_v14 = vld [vmem:[#allocation9 + $0x34] sm:$0xf]  ;;  %v1747_v16 = vld [vmem:[#allocation9 + $0xc0] sm:$0xf]  ;;  %v1952_v23 = vor.u32 %v2141_v13, %v1951_v10 }
  0x53   :  { %675 = vmatpush.bf16.msrb.mxu1 %v1572_v52  ;;  %v1784_v52 = vor.u32 %v2099_v46, %v1783_v45  ;;  %v2090_v17 = vld [vmem:[#allocation9 + $0xc8] sm:$0xf0]  ;;  %v1833_v20 = vld [vmem:[#allocation9 + $0x174] sm:$0xf0]  ;;  %v1821_v35 = vld [vmem:[#allocation9 + $0x15c] sm:$0xf0] }
  0x54   :  { %688 = vmatpush.bf16.msrb.mxu2 %v1576_v57  ;;  %v2096_v57 = vld [vmem:[#allocation9 + $0xf8] sm:$0xf0]  ;;  %v2110_v18 = vld [vmem:[#allocation9 + $0x16c] sm:$0xf]  ;;  %v2025_v33 = vld [vmem:[#allocation9 + $0x2f4] sm:$0xf0] }
  0x55   :  { %1213 = vmatpush.bf16.msrb.mxu3 %v1664_v7  ;;  %v1855_v7 = vld [vmem:[#allocation9 + $0x198] sm:$0xf]  ;;  %v2114_v22 = vld [vmem:[#allocation9 + $0x188] sm:$0xf0]  ;;  %v1836_v30 = vor.u32 %v2110_v18, %v1833_v20  ;;  %v2155_v43 = vld [vmem:[#allocation9 + $0x2d4] sm:$0xf] }
  0x56   :  { %663 = vmatpush.bf16.msrb.mxu0 %v1556_v61  ;;  %v1976_v61 = vor.u32 %v2147_v53, %v1975_v50  ;;  %v2138_v29 = vld [vmem:[#allocation9 + $0x248] sm:$0xf0]  ;;  %v2013_v44 = vld [vmem:[#allocation9 + $0x2dc] sm:$0xf0]  ;;  %v2104_v45 = vld [vmem:[#allocation9 + $0x13c] sm:$0xf] }
  0x57   :  { %676 = vmatpush.bf16.msrb.mxu1 %v1560_v1  ;;  %v2144_v1 = vld [vmem:[#allocation9 + $0x278] sm:$0xf0]  ;;  %v2158_v32 = vld [vmem:[#allocation9 + $0x2ec] sm:$0xf]  ;;  %v1809_v46 = vld [vmem:[#allocation9 + $0x144] sm:$0xf0] }
  0x58   :  { %689 = vmatpush.bf16.msrb.mxu2 %v1564_v8  ;;  %v2117_v8 = vld [vmem:[#allocation9 + $0x1a0] sm:$0xf0]  ;;  %v1964_v9 = vor.u32 %v2144_v1, %v1963_v62  ;;  %v2128_v48 = vld [vmem:[#allocation9 + $0x1fc] sm:$0xf]  ;;  %v1905_v49 = vld [vmem:[#allocation9 + $0x204] sm:$0xf0]  ;;  %v1812_v50 = vor.u32 %v2104_v45, %v1809_v46 }
  0x59   :  { %664 = vmatmul.bf16.vlgmr.msrb.gmra.mxu0 %v2417_v42  ;;  %1214 = vmatpush.bf16.msrb.mxu3 %v1652_v24  ;;  %v1856_v19 = vor.u32 %v2117_v8, %v1855_v7  ;;  %v2134_v24 = vld [vmem:[#allocation9 + $0x22c] sm:$0xf]  ;;  %v2101_v53 = vld [vmem:[#allocation9 + $0x124] sm:$0xf]  ;;  %v1797_v54 = vld [vmem:[#allocation9 + $0x12c] sm:$0xf0]  ;;  %v1908_v55 = vor.u32 %v2128_v48, %v1905_v49 }
  0x5a   :  { %1220 = vmatpush.bf16.msra.mxu0 %v1832_v0  ;;  %677 = vmatmul.bf16.vlgmr.msrb.gmra.mxu1 %v2417_v42  ;;  %v1772_v0 = vor.u32 %v2096_v57, %v1771_v56  ;;  %v2125_v56 = vld [vmem:[#allocation9 + $0x1e4] sm:$0xf]  ;;  %v1893_v57 = vld [vmem:[#allocation9 + $0x1ec] sm:$0xf0]  ;;  %v2098_v62 = vld [vmem:[#allocation9 + $0x10c] sm:$0xf] }
  0x5b   :  { %1233 = vmatpush.bf16.msra.mxu1 %v1928_v6  ;;  %690 = vmatmul.bf16.vlgmr.msrb.gmra.mxu2 %v2417_v42  ;;  %v1988_v42 = vor.u32 %v2150_v41, %v1987_v38  ;;  %v1868_v6 = vor.u32 %v2120_v60, %v1867_v59  ;;  %v2131_v38 = vld [vmem:[#allocation9 + $0x214] sm:$0xf]  ;;  %v1800_v59 = vor.u32 %v2101_v53, %v1797_v54  ;;  %v2149_v60 = vld [vmem:[#allocation9 + $0x2a4] sm:$0xf]  ;;  %v1773_v4 = vld [vmem:[#allocation9 + $0xfc] sm:$0xf0] }
  0x5c   :  { %1246 = vmatpush.bf16.msra.mxu2 %v2024_v11  ;;  %v1692_v11 = vor.u32 %v2074_v2, %v1689_v3  ;;  %v2095_v3 = vld [vmem:[#allocation9 + $0xf4] sm:$0xf]  ;;  %v1881_v7 = vld [vmem:[#allocation9 + $0x1d4] sm:$0xf0]  ;;  %v2146_v8 = vld [vmem:[#allocation9 + $0x28c] sm:$0xf] }
  0x5d   :  { %1259 = vmatpush.bf16.msra.mxu3 %v1740_v27  ;;  %v1748_v27 = vor.u32 %v2090_v17, %v1747_v16  ;;  %v1776_v5 = vor.u32 %v2095_v3, %v1773_v4  ;;  %v1977_v10 = vld [vmem:[#allocation9 + $0x294] sm:$0xf0]  ;;  %v1665_v13 = vld [vmem:[#allocation9 + $0x24] sm:$0xf0]  ;;  %v2119_v18 = vld [vmem:[#allocation9 + $0x1b4] sm:$0xf] }
  0x5e   :  { %1221 = vmatpush.bf16.msra.mxu0 %v1820_v15  ;;  %v1677_v15 = vld [vmem:[#allocation9 + $0x3c] sm:$0xf0]  ;;  %v1761_v16 = vld [vmem:[#allocation9 + $0xe4] sm:$0xf0]  ;;  %v2143_v20 = vld [vmem:[#allocation9 + $0x274] sm:$0xf] }
  0x5f   :  { %1234 = vmatpush.bf16.msra.mxu1 %v1916_v21  ;;  %v1843_v21 = vld [vmem:[#allocation9 + $0x180] sm:$0xf]  ;;  %v1680_v26 = vor.u32 %v2071_v14, %v1677_v15  ;;  %v2092_v14 = vld [vmem:[#allocation9 + $0xdc] sm:$0xf]  ;;  %v1743_v49 = vld [vmem:[#allocation9 + $0xb0] sm:$0xf] }
  0x60   :  { %1247 = vmatpush.bf16.msra.mxu2 %v2012_v25  ;;  %v1929_v25 = vld [vmem:[#allocation9 + $0x234] sm:$0xf0]  ;;  %v1844_v31 = vor.u32 %v2114_v22, %v1843_v21  ;;  %v1764_v17 = vor.u32 %v2092_v14, %v1761_v16  ;;  %v1965_v22 = vld [vmem:[#allocation9 + $0x27c] sm:$0xf0]  ;;  %v2082_v14 = vld [vmem:[#allocation9 + $0x88] sm:$0xf0] }
  0x61   :  { %1260 = vmatpush.bf16.msra.mxu3 %v1728_v39  ;;  %v1932_v36 = vor.u32 %v2134_v24, %v1929_v25  ;;  %v1917_v39 = vld [vmem:[#allocation9 + $0x21c] sm:$0xf0]  ;;  %v2065_v24 = vld [vmem:[#allocation9 + $0x4] sm:$0xf]  ;;  %v1653_v25 = vld [vmem:[#allocation9 + $0xc] sm:$0xf0] }
  0x62   :  { %1222 = vmatpush.bf16.msra.mxu0 %v1808_v28  ;;  %v1939_v28 = vld [vmem:[#allocation9 + $0x240] sm:$0xf]  ;;  %vm1388_vm0 = vcmask 1043456   ;;  %s2356_s11 = smov [#allocation12]   ;;  %s1413_s15 = sshll.u32 %s2466_s8, 4  ;;  %vm1404_vm1 = vcmask 24576   ;;  %s1414_s15 = int_to_ptr.hbm [resolvable:$true] %s1413_s15 }
  0x63   :  { %1235 = vmatpush.bf16.msra.mxu1 %v1904_v34  ;;  %v2107_v34 = vld [vmem:[#allocation9 + $0x154] sm:$0xf]  ;;  %v1815_v16 = vld [vmem:[#allocation9 + $0x140] sm:$0xf]  ;;  %s1411_s12 = sshll.u32 %s2356_s11, 4  ;;  %s1412_s12 = int_to_ptr.vmem [resolvable:$true] %s1411_s12 }
  0x64   :  { %1248 = vmatpush.bf16.msra.mxu2 %v2000_v37  ;;  %v1940_v37 = vor.u32 %v2138_v29, %v1939_v28  ;;  %v1824_v41 = vor.u32 %v2107_v34, %v1821_v35  ;;  %v1749_v28 = vld [vmem:[#allocation9 + $0xcc] sm:$0xf0]  ;;  %v1953_v34 = vld [vmem:[#allocation9 + $0x264] sm:$0xf0] }
  0x65   :  { %1261 = vmatpush.bf16.msra.mxu3 %v1716_v51  ;;  %v2152_v51 = vld [vmem:[#allocation9 + $0x2bc] sm:$0xf] }
  0x66   :  { %1223 = vmatpush.bf16.msra.mxu0 %v1796_v40  ;;  %v2028_v40 = vor.u32 %v2158_v32, %v2025_v33  ;;  %v2140_v33 = vld [vmem:[#allocation9 + $0x25c] sm:$0xf] }
  0x67   :  { %1236 = vmatpush.bf16.msra.mxu1 %v1892_v47  ;;  %v1920_v47 = vor.u32 %v2131_v38, %v1917_v39  ;;  %v1956_v35 = vor.u32 %v2140_v33, %v1953_v34  ;;  %v2137_v39 = vld [vmem:[#allocation9 + $0x244] sm:$0xf] }
  0x68   :  { %1249 = vmatpush.bf16.msra.mxu2 %v1988_v42  ;;  %v2016_v42 = vor.u32 %v2155_v43, %v2013_v44  ;;  %v138_v43 = vld [vmem:[#allocation8] sm:$0xf] }
  0x69   :  { %1262 = vmatpush.bf16.msra.mxu3 %v1704_v63  ;;  %v1785_v63 = vld [vmem:[#allocation9 + $0x114] sm:$0xf0]  ;;  %v140_v44 = vperm.slane %v138_v43, 0  ;;  %v141_v45 = vperm.slane %v138_v43, 1 }
  0x6a   :  { %1224 = vmatpush.bf16.msra.mxu0 %v1784_v52  ;;  %v2001_v52 = vld [vmem:[#allocation9 + $0x2c4] sm:$0xf0]  ;;  %v1788_v2 = vor.u32 %v2098_v62, %v1785_v63  ;;  %v1827_v63 = vld [vmem:[#allocation9 + $0x158] sm:$0xf] }
  0x6b   :  { %1237 = vmatpush.bf16.msra.mxu1 %v1880_v58  ;;  %v2004_v58 = vor.u32 %v2152_v51, %v2001_v52  ;;  %v1839_v51 = vld [vmem:[#allocation9 + $0x170] sm:$0xf]  ;;  %v2112_v52 = vld [vmem:[#allocation9 + $0x178] sm:$0xf0] }
  0x6c   :  { %1250 = vmatpush.bf16.msra.mxu2 %v1976_v61  ;;  %v1989_v61 = vld [vmem:[#allocation9 + $0x2ac] sm:$0xf0] }
  0x6d   :  { %1263 = vmatpush.bf16.msra.mxu3 %v1692_v11  ;;  %v1992_v1 = vor.u32 %v2149_v60, %v1989_v61  ;;  %v1980_v11 = vor.u32 %v2146_v8, %v1977_v10  ;;  %v1731_v60 = vld [vmem:[#allocation9 + $0x98] sm:$0xf]  ;;  %v2085_v61 = vld [vmem:[#allocation9 + $0xa0] sm:$0xf0]  ;;  %v2031_v8 = vld [vmem:[#allocation9 + $0x2f0] sm:$0xf] }
  0x6e   :  { %1225 = vmatpush.bf16.msra.mxu0 %v1772_v0  ;;  %v1896_v0 = vor.u32 %v2125_v56, %v1893_v57 }
  0x6f   :  { %1238 = vmatpush.bf16.msra.mxu1 %v1868_v6  ;;  %v2122_v6 = vld [vmem:[#allocation9 + $0x1cc] sm:$0xf] }
  0x70   :  { %1251 = vmatpush.bf16.msra.mxu2 %v1964_v9  ;;  %v1884_v9 = vor.u32 %v2122_v6, %v1881_v7  ;;  %v1935_v6 = vld [vmem:[#allocation9 + $0x230] sm:$0xf]  ;;  %v2136_v7 = vld [vmem:[#allocation9 + $0x238] sm:$0xf0] }
  0x71   :  { %1264 = vmatpush.bf16.msra.mxu3 %v1680_v26  ;;  %v1656_v26 = vor.u32 %v2065_v24, %v1653_v25  ;;  %v2133_v24 = vld [vmem:[#allocation9 + $0x220] sm:$0xf0]  ;;  %v2019_v25 = vld [vmem:[#allocation9 + $0x2d8] sm:$0xf] }
  0x72   :  { %1226 = vmatpush.bf16.msra.mxu0 %v1760_v12  ;;  %v2068_v12 = vld [vmem:[#allocation9 + $0x1c] sm:$0xf] }
  0x73   :  { %1239 = vmatpush.bf16.msra.mxu1 %v1856_v19  ;;  %v1668_v15 = vor.u32 %v2068_v12, %v1665_v13  ;;  %v1869_v19 = vld [vmem:[#allocation9 + $0x1bc] sm:$0xf0]  ;;  %v2160_v12 = vld [vmem:[#allocation9 + $0x2f8] sm:$0xf0] }
  0x74   :  { %1252 = vmatpush.bf16.msra.mxu2 %v1952_v23  ;;  %v1872_v21 = vor.u32 %v2119_v18, %v1869_v19  ;;  %v1968_v23 = vor.u32 %v2143_v20, %v1965_v22  ;;  %v1719_v13 = vld [vmem:[#allocation9 + $0x80] sm:$0xf]  ;;  %v1936_v19 = vor.u32 %v2136_v7, %v1935_v6  ;;  %v2070_v6 = vld [vmem:[#allocation9 + $0x28] sm:$0xf0] }
  0x75   :  { %1265 = vmatpush.bf16.msra.mxu3 %v1668_v15  ;;  %v1720_v22 = vor.u32 %v2082_v14, %v1719_v13  ;;  %v1767_v7 = vld [vmem:[#allocation9 + $0xe0] sm:$0xf] }
  0x76   :  { %1227 = vmatpush.bf16.msra.mxu0 %v1748_v27  ;;  %v2089_v27 = vld [vmem:[#allocation9 + $0xc4] sm:$0xf] }
  0x77   :  { %1240 = vmatpush.bf16.msra.mxu1 %v1844_v31  ;;  %v1752_v29 = vor.u32 %v2089_v27, %v1749_v28  ;;  %v1857_v31 = vld [vmem:[#allocation9 + $0x1a4] sm:$0xf0]  ;;  %v2157_v28 = vld [vmem:[#allocation9 + $0x2e0] sm:$0xf0] }
  0x78   :  { %1253 = vmatpush.bf16.msra.mxu2 %v1940_v37  ;;  %v1845_v37 = vld [vmem:[#allocation9 + $0x18c] sm:$0xf0] }
  0x79   :  { %1266 = vmatpush.bf16.msra.mxu3 %v1656_v26 }
  0x7a   :  { %1272 = vmatpush.bf16.msrb.mxu0 %v1836_v30  ;;  %v2116_v30 = vld [vmem:[#allocation9 + $0x19c] sm:$0xf] }
  0x7b   :  { %1285 = vmatpush.bf16.msrb.mxu1 %v1932_v36  ;;  %v1860_v32 = vor.u32 %v2116_v30, %v1857_v31  ;;  %v2113_v36 = vld [vmem:[#allocation9 + $0x184] sm:$0xf]  ;;  %v2079_v30 = vld [vmem:[#allocation9 + $0x70] sm:$0xf0]  ;;  %v1803_v31 = vld [vmem:[#allocation9 + $0x128] sm:$0xf] }
  0x7c   :  { %1298 = vmatpush.bf16.msrb.mxu2 %v2028_v40  ;;  %v1848_v38 = vor.u32 %v2113_v36, %v1845_v37  ;;  %v1941_v40 = vld [vmem:[#allocation9 + $0x24c] sm:$0xf0]  ;;  %v2020_v36 = vor.u32 %v2157_v28, %v2019_v25  ;;  %v2118_v28 = vld [vmem:[#allocation9 + $0x1a8] sm:$0xf0] }
  0x7e   :  { %1273 = vmatpush.bf16.msrb.mxu0 %v1824_v41  ;;  %v1944_v41 = vor.u32 %v2137_v39, %v1941_v40  ;;  %v2130_v39 = vld [vmem:[#allocation9 + $0x208] sm:$0xf0] }
  0x7f   :  { %1286 = vmatpush.bf16.msrb.mxu1 %v1920_v47 }
  0x80   :  { %1299 = vmatpush.bf16.msrb.mxu2 %v2016_v42  ;;  %v2088_v42 = vld [vmem:[#allocation9 + $0xb8] sm:$0xf0] }
  0x81   :  { %v1744_v56 = vor.u32 %v2088_v42, %v1743_v49  ;;  %v1899_v42 = vld [vmem:[#allocation9 + $0x1e8] sm:$0xf] }
  0x82   :  { %1274 = vmatpush.bf16.msrb.mxu0 %v1812_v50 }
  0x83   :  { %1287 = vmatpush.bf16.msrb.mxu1 %v1908_v55  ;;  %v142_v55 = vperm.slane %v138_v43, 2 }
  0x84   :  { %1300 = vmatpush.bf16.msrb.mxu2 %v2004_v58  ;;  %v143_v58 = vperm.slane %v138_v43, 3  ;;  %v2154_v43 = vld [vmem:[#allocation9 + $0x2c8] sm:$0xf0] }
  0x86   :  { %1275 = vmatpush.bf16.msrb.mxu0 %v1800_v59  ;;  %v1840_v59 = vor.u32 %v2112_v52, %v1839_v51 }
  0x87   :  { %1288 = vmatpush.bf16.msrb.mxu1 %v1896_v0  ;;  %v2109_v0 = vld [vmem:[#allocation9 + $0x160] sm:$0xf0] }
  0x88   :  { %1301 = vmatpush.bf16.msrb.mxu2 %v1992_v1 }
  0x8a   :  { %1276 = vmatpush.bf16.msrb.mxu0 %v1788_v2 }
  0x8b   :  { %1289 = vmatpush.bf16.msrb.mxu1 %v1884_v9 }
  0x8c   :  { %1302 = vmatpush.bf16.msrb.mxu2 %v1980_v11  ;;  %v1828_v11 = vor.u32 %v2109_v0, %v1827_v63  ;;  %v1887_v63 = vld [vmem:[#allocation9 + $0x1d0] sm:$0xf]  ;;  %v2124_v0 = vld [vmem:[#allocation9 + $0x1d8] sm:$0xf0] }
  0x8e   :  { %1277 = vmatpush.bf16.msrb.mxu0 %v1776_v5  ;;  %v1732_v5 = vor.u32 %v2085_v61, %v1731_v60 }
  0x8f   :  { %1290 = vmatpush.bf16.msrb.mxu1 %v1872_v21  ;;  %v2032_v21 = vor.u32 %v2160_v12, %v2031_v8  ;;  %v2094_v8 = vld [vmem:[#allocation9 + $0xe8] sm:$0xf0]  ;;  %v2121_v12 = vld [vmem:[#allocation9 + $0x1c0] sm:$0xf0] }
  0x90   :  { %1303 = vmatpush.bf16.msrb.mxu2 %v1968_v23  ;;  %v1923_v23 = vld [vmem:[#allocation9 + $0x218] sm:$0xf]  ;;  %v1768_v14 = vor.u32 %v2094_v8, %v1767_v7 }
  0x91   :  { %v1924_v34 = vor.u32 %v2133_v24, %v1923_v23 }
  0x92   :  { %1278 = vmatpush.bf16.msrb.mxu0 %v1764_v17  ;;  %v2106_v17 = vld [vmem:[#allocation9 + $0x148] sm:$0xf0] }
  0x93   :  { %1291 = vmatpush.bf16.msrb.mxu1 %v1860_v32  ;;  %v1816_v27 = vor.u32 %v2106_v17, %v1815_v16  ;;  %v2103_v32 = vld [vmem:[#allocation9 + $0x130] sm:$0xf0]  ;;  %v2145_v16 = vld [vmem:[#allocation9 + $0x280] sm:$0xf0]  ;;  %v1659_v17 = vld [vmem:[#allocation9 + $0x8] sm:$0xf] }
  0x94   :  { %1304 = vmatpush.bf16.msrb.mxu2 %v1956_v35  ;;  %v1804_v40 = vor.u32 %v2103_v32, %v1803_v31  ;;  %v1959_v31 = vld [vmem:[#allocation9 + $0x260] sm:$0xf]  ;;  %v2142_v32 = vld [vmem:[#allocation9 + $0x268] sm:$0xf0] }
  0x96   :  { %1279 = vmatpush.bf16.msrb.mxu0 %v1752_v29  ;;  %v1707_v29 = vld [vmem:[#allocation9 + $0x68] sm:$0xf] }
  0x97   :  { %1292 = vmatpush.bf16.msrb.mxu1 %v1848_v38  ;;  %v1708_v37 = vor.u32 %v2079_v30, %v1707_v29  ;;  %v1911_v38 = vld [vmem:[#allocation9 + $0x200] sm:$0xf] }
  0x98   :  { %1305 = vmatpush.bf16.msrb.mxu2 %v1944_v41  ;;  %v2007_v41 = vld [vmem:[#allocation9 + $0x2c0] sm:$0xf] }
  0x99   :  { %v2008_v49 = vor.u32 %v2154_v43, %v2007_v41 }
  0xb6   :  { %v317_v46 = vpop.f32.mrf.mxu0 }
  0xb7   :  { %v318_v47 = vadd.f32 %v317_v46, %v140_v44  ;;  %v330_v48 = vpop.f32.mrf.mxu1  ;;  %v1695_v44 = vld [vmem:[#allocation9 + $0x50] sm:$0xf] }
  0xb8   :  { %v331_v50 = vadd.f32 %v330_v48, %v141_v45  ;;  %v2076_v45 = vld [vmem:[#allocation9 + $0x58] sm:$0xf0]  ;;  %v1791_v46 = vld [vmem:[#allocation9 + $0x110] sm:$0xf]  ;;  %v1912_v48 = vor.u32 %v2130_v39, %v1911_v38  ;;  %v2139_v38 = vld [vmem:[#allocation9 + $0x250] sm:$0xf0] }
  0xb9   :  { %v360_v53 = vmax.f32 %v318_v47, 0.0  ;;  %v2100_v47 = vld [vmem:[#allocation9 + $0x118] sm:$0xf0]  ;;  %v1696_v51 = vor.u32 %v2076_v45, %v1695_v44 }
  0xba   :  { %v361_v54 = vmax.f32 %v331_v50, 0.0  ;;  %v2127_v50 = vld [vmem:[#allocation9 + $0x1f0] sm:$0xf0]  ;;  %v1792_v52 = vor.u32 %v2100_v47, %v1791_v46 }
  0xbb   :  { %v2426_v57 = vpack.c.bf16 %v360_v53, %v360_v53  ;;  %v1995_v53 = vld [vmem:[#allocation9 + $0x2a8] sm:$0xf]  ;;  %v1900_v60 = vor.u32 %v2127_v50, %v1899_v42 }
  0xbc   :  { %v2428_v62 = vpack.c.bf16 %v361_v54, %v361_v54  ;;  %v2151_v54 = vld [vmem:[#allocation9 + $0x2b0] sm:$0xf0] }
  0xbd   :  { %1215 = vmatmul.bf16.vlgmr.msrb.gmra.mxu3 %v2426_v57  ;;  %v1996_v61 = vor.u32 %v2151_v54, %v1995_v53 }
  0xbe   :  { %v343_v1 = vpop.f32.mrf.mxu2  ;;  %1228 = vmatmul.bf16.vlgmr.msra.gmra.mxu0 %v2428_v62  ;;  %v319_v4 = vpop.f32.mrf.mxu0  ;;  %1311 = vmatpush.bf16.msrb.mxu3 %v1744_v56  ;;  %v2073_v56 = vld [vmem:[#allocation9 + $0x40] sm:$0xf0] }
  0xbf   :  { %v344_v2 = vadd.f32 %v343_v1, %v142_v55  ;;  %v356_v3 = vpop.f32.mrf.mxu3  ;;  %v332_v10 = vpop.f32.mrf.mxu1  ;;  %1324 = vmatpush.bf16.msra.mxu0 %v1840_v59  ;;  %v1683_v55 = vld [vmem:[#allocation9 + $0x38] sm:$0xf]  ;;  %v2097_v59 = vld [vmem:[#allocation9 + $0x100] sm:$0xf0]  ;;  %v2148_v4 = vld [vmem:[#allocation9 + $0x298] sm:$0xf0] }
  0xc0   :  { %v357_v9 = vadd.f32 %v356_v3, %v143_v58  ;;  %v1779_v58 = vld [vmem:[#allocation9 + $0xf8] sm:$0xf]  ;;  %v1684_v1 = vor.u32 %v2073_v56, %v1683_v55  ;;  %v1983_v3 = vld [vmem:[#allocation9 + $0x290] sm:$0xf] }
  0xc1   :  { %v362_v15 = vmax.f32 %v344_v2, 0.0  ;;  %v1780_v2 = vor.u32 %v2097_v59, %v1779_v58  ;;  %v1984_v10 = vor.u32 %v2148_v4, %v1983_v3 }
  0xc2   :  { %v363_v18 = vmax.f32 %v357_v9, 0.0  ;;  %1312 = vmatpush.bf16.msrb.mxu3 %v1732_v5  ;;  %v1671_v5 = vld [vmem:[#allocation9 + $0x20] sm:$0xf]  ;;  %v1888_v9 = vor.u32 %v2124_v0, %v1887_v63  ;;  %v1363_v0 = vld [vmem:[%s2463_s5] sm:$0x7] }
  0xc3   :  { %v2432_v20 = vpack.c.bf16 %v362_v15, %v362_v15  ;;  %1325 = vmatpush.bf16.msra.mxu0 %v1828_v11  ;;  %v1875_v11 = vld [vmem:[#allocation9 + $0x1b8] sm:$0xf]  ;;  %v1672_v13 = vor.u32 %v2070_v6, %v1671_v5  ;;  %v1366_v3 = vperm.slane %v1363_v0, 1  ;;  %v1365_v5 = vperm.slane %v1363_v0, 0 }
  0xc4   :  { %v2434_v26 = vpack.c.bf16 %v363_v18, %v363_v18  ;;  %v1971_v15 = vld [vmem:[#allocation9 + $0x278] sm:$0xf]  ;;  %v2067_v18 = vld [vmem:[#allocation9 + $0x10] sm:$0xf0]  ;;  %v1876_v23 = vor.u32 %v2121_v12, %v1875_v11 }
  0xc5   :  { %1241 = vmatmul.bf16.vlgmr.msra.gmra.mxu1 %v2432_v20  ;;  %v1972_v25 = vor.u32 %v2145_v16, %v1971_v15  ;;  %v1660_v29 = vor.u32 %v2067_v18, %v1659_v17 }
  0xc6   :  { %1254 = vmatmul.bf16.vlgmr.msra.gmra.mxu2 %v2434_v26  ;;  %v345_v33 = vpop.f32.mrf.mxu2  ;;  %1337 = vmatpush.bf16.msra.mxu1 %v1936_v19  ;;  %v1755_v19 = vld [vmem:[#allocation9 + $0xc8] sm:$0xf] }
  0xc7   :  { %v358_v35 = vpop.f32.mrf.mxu3  ;;  %1350 = vmatpush.bf16.msra.mxu2 %v2032_v21  ;;  %1313 = vmatpush.bf16.msrb.mxu3 %v1720_v22  ;;  %v2091_v21 = vld [vmem:[#allocation9 + $0xd0] sm:$0xf0] }
  0xc8   :  { %1326 = vmatpush.bf16.msra.mxu0 %v1816_v27  ;;  %v1863_v27 = vld [vmem:[#allocation9 + $0x1a0] sm:$0xf]  ;;  %v1756_v30 = vor.u32 %v2091_v21, %v1755_v19  ;;  %v1851_v35 = vld [vmem:[#allocation9 + $0x188] sm:$0xf]  ;;  %v1367_v19 = vperm.slane %v1363_v0, 2 }
  0xc9   :  { %v1864_v33 = vor.u32 %v2118_v28, %v1863_v27 }
  0xca   :  { %1338 = vmatpush.bf16.msra.mxu1 %v1924_v34  ;;  %v1960_v34 = vor.u32 %v2142_v32, %v1959_v31 }
  0xcb   :  { %1351 = vmatpush.bf16.msra.mxu2 %v2020_v36  ;;  %1314 = vmatpush.bf16.msrb.mxu3 %v1708_v37  ;;  %v2115_v36 = vld [vmem:[#allocation9 + $0x190] sm:$0xf0]  ;;  %v1947_v37 = vld [vmem:[#allocation9 + $0x248] sm:$0xf] }
  0xcc   :  { %1327 = vmatpush.bf16.msra.mxu0 %v1804_v40  ;;  %v1852_v40 = vor.u32 %v2115_v36, %v1851_v35  ;;  %v1948_v44 = vor.u32 %v2139_v38, %v1947_v37 }
  0xcd   :  { %1267 = vmatmul.bf16.vlgmr.msra.gmra.mxu3 %v2426_v57 }
  0xce   :  { %1339 = vmatpush.bf16.msra.mxu1 %v1912_v48  ;;  %1280 = vmatmul.bf16.vlgmr.msrb.gmra.mxu0 %v2428_v62 }
  0xcf   :  { %1352 = vmatpush.bf16.msra.mxu2 %v2008_v49  ;;  %1315 = vmatpush.bf16.msrb.mxu3 %v1696_v51 }
  0xd0   :  { %1328 = vmatpush.bf16.msra.mxu0 %v1792_v52 }
  0xd2   :  { %1340 = vmatpush.bf16.msra.mxu1 %v1900_v60 }
  0xd3   :  { %1353 = vmatpush.bf16.msra.mxu2 %v1996_v61  ;;  %1316 = vmatpush.bf16.msrb.mxu3 %v1684_v1 }
  0xd4   :  { %1329 = vmatpush.bf16.msra.mxu0 %v1780_v2 }
  0xd5   :  { %1293 = vmatmul.bf16.vlgmr.msrb.gmra.mxu1 %v2432_v20 }
  0xd6   :  { %v665_v22 = vpop.f32.mrf.mxu0  ;;  %1306 = vmatmul.bf16.vlgmr.msrb.gmra.mxu2 %v2434_v26  ;;  %1341 = vmatpush.bf16.msra.mxu1 %v1888_v9 }
  0xd7   :  { %v678_v24 = vpop.f32.mrf.mxu1  ;;  %1354 = vmatpush.bf16.msra.mxu2 %v1984_v10  ;;  %1317 = vmatpush.bf16.msrb.mxu3 %v1672_v13 }
  0xd8   :  { %1330 = vmatpush.bf16.msra.mxu0 %v1768_v14  ;;  %v1377_v14 = vld [vmem:[%s2464_s6] sm:$0x7] }
  0xd9   :  { %v1380_v16 = vperm.slane %v1377_v14, 1  ;;  %v1379_v21 = vperm.slane %v1377_v14, 0 }
  0xda   :  { %1342 = vmatpush.bf16.msra.mxu1 %v1876_v23 }
  0xdb   :  { %1355 = vmatpush.bf16.msra.mxu2 %v1972_v25  ;;  %1318 = vmatpush.bf16.msrb.mxu3 %v1660_v29  ;;  %v1381_v29 = vperm.slane %v1377_v14, 2 }
  0xdc   :  { %1331 = vmatpush.bf16.msra.mxu0 %v1756_v30 }
  0xde   :  { %v667_v39 = vpop.f32.mrf.mxu0  ;;  %1343 = vmatpush.bf16.msra.mxu1 %v1864_v33  ;;  %v691_v41 = vpop.f32.mrf.mxu2  ;;  %1319 = vmatmul.bf16.vlgmr.msrb.gmra.mxu3 %v2426_v57 }
  0xdf   :  { %v680_v43 = vpop.f32.mrf.mxu1  ;;  %1356 = vmatpush.bf16.msra.mxu2 %v1960_v34  ;;  %1332 = vmatmul.bf16.vlgmr.msra.gmra.mxu0 %v2428_v62  ;;  %v1400_v39 = vlaneseq }
  0xe2   :  { %1344 = vmatpush.bf16.msra.mxu1 %v1852_v40  ;;  %v1397_v40 = vstv %s2465_s7 }
  0xe3   :  { %1357 = vmatpush.bf16.msra.mxu2 %v1948_v44 }
  0xe5   :  { %1345 = vmatmul.bf16.vlgmr.msra.gmra.mxu1 %v2432_v20 }
  0xe6   :  { %1358 = vmatmul.bf16.vlgmr.msra.gmra.mxu2 %v2434_v26  ;;  %v693_v45 = vpop.f32.mrf.mxu2 }
 0x13b   :  { %v1229_v46 = vpop.f32.mrf.mxu0 }
 0x140   :  { %v1216_v47 = vpop.f32.mrf.mxu3 }
 0x141   :  { %v1217_v62 = vadd.f32 %v1216_v47, %v665_v22 }
 0x142   :  { %v1242_v48 = vpop.f32.mrf.mxu1 }
 0x143   :  { %v1231_v49 = vpop.f32.mrf.mxu0  ;;  %v1230_v59 = vadd.f32 %v1229_v46, %v1217_v62 }
 0x145   :  { %v1243_v63 = vadd.f32 %v1242_v48, %v1230_v59 }
 0x148   :  { %v1218_v50 = vpop.f32.mrf.mxu3 }
 0x149   :  { %v1255_v42 = vpop.f32.mrf.mxu2 }
 0x14a   :  { %v1244_v51 = vpop.f32.mrf.mxu1  ;;  %v1256_v4 = vadd.f32 %v1255_v42, %v1243_v63 }
 0x14b   :  { %v1281_v52 = vpop.f32.mrf.mxu0 }
 0x14c   :  { %v1371_v11 = vadd.f32 %v1365_v5, %v1256_v4 }
 0x14e   :  { %v1374_v18 = vmax.f32 %v1371_v11, 0.0 }
 0x150   :  { %v1268_v57 = vpop.f32.mrf.mxu3  ;;  %v1385_v30 = vmul.f32 %v1379_v21, %v1374_v18 }
 0x151   :  { %v1257_v53 = vpop.f32.mrf.mxu2  ;;  %v1269_v54 = vadd.f32 %v1268_v57, %v678_v24 }
 0x152   :  { %v1294_v55 = vpop.f32.mrf.mxu1  ;;  %v1389_v34 = vsel %vm1388_vm0, %v1385_v30, 0.0 }
 0x153   :  { %v1283_v56 = vpop.f32.mrf.mxu0  ;;  %v1282_v58 = vadd.f32 %v1281_v52, %v1269_v54 }
 0x155   :  { %v1295_v26 = vadd.f32 %v1294_v55, %v1282_v58 }
 0x158   :  { %v1270_v60 = vpop.f32.mrf.mxu3 }
 0x159   :  { %v1307_v20 = vpop.f32.mrf.mxu2 }
 0x15a   :  { %v1296_v61 = vpop.f32.mrf.mxu1  ;;  %v1308_v2 = vadd.f32 %v1307_v20, %v1295_v26 }
 0x15c   :  { %v1333_v1 = vpop.f32.mrf.mxu0  ;;  %v1372_v7 = vadd.f32 %v1366_v3, %v1308_v2 }
 0x15e   :  { %v1375_v15 = vmax.f32 %v1372_v7, 0.0 }
 0x160   :  { %v1386_v27 = vmul.f32 %v1380_v16, %v1375_v15 }
 0x161   :  { %v1309_v6 = vpop.f32.mrf.mxu2  ;;  %v1320_v8 = vpop.f32.mrf.mxu3 }
 0x162   :  { %v1346_v9 = vpop.f32.mrf.mxu1  ;;  %v1321_v10 = vadd.f32 %v1320_v8, %v691_v41  ;;  %v1390_v32 = vsel %vm1388_vm0, %v1386_v27, 0.0  ;;  %v1401_v41 = vand.u32 127, %v1400_v39 }
 0x163   :  { %v1391_v36 = vadd.f32 %v1390_v32, %v1389_v34 }
 0x164   :  { %v1334_v12 = vadd.f32 %v1333_v1, %v1321_v10  ;;  %v1335_v13 = vpop.f32.mrf.mxu0 }
 0x166   :  { %v1347_v17 = vadd.f32 %v1346_v9, %v1334_v12 }
 0x169   :  { %v1359_v22 = vpop.f32.mrf.mxu2  ;;  %v1322_v24 = vpop.f32.mrf.mxu3 }
 0x16a   :  { %v1360_v23 = vadd.f32 %v1359_v22, %v1347_v17  ;;  %v1348_v25 = vpop.f32.mrf.mxu1 }
 0x16c   :  { %v1373_v28 = vadd.f32 %v1367_v19, %v1360_v23 }
 0x16e   :  { %v1376_v31 = vmax.f32 %v1373_v28, 0.0 }
 0x170   :  { %v1387_v33 = vmul.f32 %v1381_v29, %v1376_v31 }
 0x171   :  { %v1361_v35 = vpop.f32.mrf.mxu2 }
 0x172   :  { %v1392_v37 = vsel %vm1388_vm0, %v1387_v33, 0.0 }
 0x173   :  { %v1393_v38 = vadd.f32 %v1392_v37, %v1391_v36 }
 0x175   :  { %1394 = vadd.xlane.f32.xlu0 %v1393_v38 }
 0x1e8   :  { %v1395_v43 = vpop.xlane.xlu0 %1394 }
 0x1e9   :  { %v1398_v44 = vadd.f32 %v1397_v40, %v1395_v43 }
 0x1eb   :  { %v1402_v45 = vperm.slane %v1398_v44, %v1401_v41 }
 0x1ed   :  { %1405 = vst.msk [vmem:[#allocation12] sm:$0x1] %vm1404_vm1, %v1402_v45 }
 0x1ee   :  { %1416 = dma.vmem_to_hbm [thread:$0]  %s1412_s12, 16, %s1414_s15, [#allocation5]  }
 0x1ef   :  { %2345 = dma.done.wait [#allocation5], 16  }
 0x1f0   :  { %2346 = vsyncadd [#allocation5], 4294967280 }
 0x1f1   :  { %1421 = vsyncpa [#allocation4], 1 }
 0x1f2   :  { %1422 = vsyncpa [#allocation7], 1 }
 0x1f3   :  { %1423 = vsyncpa [#allocation10], 1 }
 0x1f4   :  { %1424 = vsyncpa [#allocation5], 1 }

</bundles_post_ra>
